<compile_context>
chip_gen: v6e
topology: v6e:2x2x1
jax: 0.10.0
libtpu: 0.0.40
codegen_flags: <defaults>
</compile_context>

<pallas_src>
import jax
import jax.numpy as jnp
from jax.experimental import pallas as pl
from jax.experimental.pallas import tpu as pltpu


def _teacher_end_kernel(x_ref,
                        wo_ref, bo_ref,            # old:       Linear(IN -> D_OLD)
                        wa_ref, ba_ref,            # assist:    Linear(D_OLD -> D_AS) + ReLU
                        wf_ref, bf_ref,            # new.front: Linear(IN -> HID) + ReLU
                        weh_ref, wex_ref, be_ref,  # new.end:   Linear(HID+D_AS -> D_NEW), weight pre-split
                        o_ref):
    x = x_ref[...]

    # old: y1 = x @ Wo + bo
    y1 = jnp.dot(x, wo_ref[...], preferred_element_type=jnp.float32) + bo_ref[...]

    # assist: x2 = relu(y1 @ Wa + ba)
    x2 = jnp.maximum(
        jnp.dot(y1, wa_ref[...], preferred_element_type=jnp.float32) + ba_ref[...], 0.0)

    # new.front: h = relu(x @ Wf + bf)
    h = jnp.maximum(
        jnp.dot(x, wf_ref[...], preferred_element_type=jnp.float32) + bf_ref[...], 0.0)

    # new.end: cat([h, x2], -1) @ We + be  ==  h @ We_h + x2 @ We_x + be
    # (weight split in the wrapper -> no lane-axis concat / XLU relayout in-kernel)
    y2 = (jnp.dot(h, weh_ref[...], preferred_element_type=jnp.float32)
          + jnp.dot(x2, wex_ref[...], preferred_element_type=jnp.float32)
          + be_ref[...])

    # torch.cat([y1, y2], dim=1): two contiguous column stores into one output tile.
    d_old = y1.shape[-1]
    o_ref[:, :d_old] = y1.astype(o_ref.dtype)
    o_ref[:, d_old:] = y2.astype(o_ref.dtype)


def _pick_batch_tile(B):
    # Prefer >= 2 grid steps (pipelining + v7x megacore) with 8-row-aligned tiles,
    # capped at 512 rows per tile.
    for cand in (512, 256, 128, 64, 32, 16, 8):
        if cand <= B and B % cand == 0 and B // cand >= 2:
            return cand
    return B


def teacher_end_model(x, params, *, batch_tile=None):
    wo, bo, wa, ba, wf, bf, we, be = params
    B, in_dim = x.shape
    d_old = wo.shape[1]
    d_as = wa.shape[1]
    hid = wf.shape[1]
    d_new = we.shape[1]
    assert wo.shape == (in_dim, d_old)
    assert wa.shape == (d_old, d_as)
    assert wf.shape == (in_dim, hid)
    assert we.shape == (hid + d_as, d_new)
    out_dim = d_old + d_new

    tb = _pick_batch_tile(B) if batch_tile is None else batch_tile
    assert B % tb == 0 and (tb % 8 == 0 or tb == B)
    grid = (B // tb,)

    # Split the "end" weight so the kernel sums two MXU dots instead of concatenating.
    we_h = we[:hid]
    we_x = we[hid:]

    # Biases as (1, N) so they broadcast as plain VPU adds inside the kernel.
    bo2 = bo.reshape(1, d_old)
    ba2 = ba.reshape(1, d_as)
    bf2 = bf.reshape(1, hid)
    be2 = be.reshape(1, d_new)

    flops = 2 * B * (in_dim * d_old + d_old * d_as + in_dim * hid
                     + hid * d_new + d_as * d_new)
    bytes_accessed = 4 * (x.size + wo.size + bo.size + wa.size + ba.size
                          + wf.size + bf.size + we.size + be.size + B * out_dim)

    def resident(shape):
        return pl.BlockSpec(shape, lambda i: (0, 0))

    return pl.pallas_call(
        _teacher_end_kernel,
        out_shape=jax.ShapeDtypeStruct((B, out_dim), jnp.float32),
        grid_spec=pltpu.PrefetchScalarGridSpec(
            num_scalar_prefetch=0,
            grid=grid,
            in_specs=[
                pl.BlockSpec((tb, in_dim), lambda i: (i, 0)),   # x: batch-tiled
                resident((in_dim, d_old)), resident((1, d_old)),   # old
                resident((d_old, d_as)), resident((1, d_as)),      # assist
                resident((in_dim, hid)), resident((1, hid)),       # new.front
                resident((hid, d_new)), resident((d_as, d_new)),   # new.end (split W)
                resident((1, d_new)),                              # new.end bias
            ],
            out_specs=pl.BlockSpec((tb, out_dim), lambda i: (i, 0)),
        ),
        compiler_params=pltpu.CompilerParams(
            dimension_semantics=("parallel",),
        ),
        cost_estimate=pl.CostEstimate(
            flops=flops, transcendentals=0, bytes_accessed=bytes_accessed),
    )(x, wo, bo2, wa, ba2, wf, bf2, we_h, we_x, be2)


def _reference(x, params):
    wo, bo, wa, ba, wf, bf, we, be = params
    y1 = x @ wo + bo                                   # old
    x2 = jnp.maximum(y1 @ wa + ba, 0.0)                # assist
    h = jnp.maximum(x @ wf + bf, 0.0)                  # new.front
    y2 = jnp.concatenate([h, x2], axis=-1) @ we + be   # new.end
    return jnp.concatenate([y1, y2], axis=-1)          # torch.cat([y1, y2], 1)


if __name__ == "__main__":
    # Small shapes consistent with the module's forward.
    B, IN_DIM, D_OLD, D_AS, HID, D_NEW = 64, 32, 16, 24, 32, 24

    key = jax.random.PRNGKey(0)
    ks = jax.random.split(key, 9)
    x = jax.random.normal(ks[0], (B, IN_DIM), dtype=jnp.float32)

    wo = jax.random.normal(ks[1], (IN_DIM, D_OLD), dtype=jnp.float32) * 0.1
    bo = jax.random.normal(ks[2], (D_OLD,), dtype=jnp.float32) * 0.01
    wa = jax.random.normal(ks[3], (D_OLD, D_AS), dtype=jnp.float32) * 0.1
    ba = jax.random.normal(ks[4], (D_AS,), dtype=jnp.float32) * 0.01
    wf = jax.random.normal(ks[5], (IN_DIM, HID), dtype=jnp.float32) * 0.1
    bf = jax.random.normal(ks[6], (HID,), dtype=jnp.float32) * 0.01
    we = jax.random.normal(ks[7], (HID + D_AS, D_NEW), dtype=jnp.float32) * 0.1
    be = jax.random.normal(ks[8], (D_NEW,), dtype=jnp.float32) * 0.01

    params = (wo, bo, wa, ba, wf, bf, we, be)

    out = teacher_end_model(x, params)        # default tile: 32 rows -> grid=(2,)
    out = jax.block_until_ready(out)

    ref = _reference(x, params)
    assert out.shape == (B, D_OLD + D_NEW)
    assert jnp.allclose(out, ref, atol=1e-5, rtol=1e-5)

    print("KERNEL_OK")
</pallas_src>

<mosaic_0001>
module attributes {stable_mosaic.version = 11 : i64} {
  func.func @_teacher_end_kernel(%arg0: i32, %arg1: memref<32x32xf32, #tpu.memory_space<vmem>>, %arg2: memref<32x16xf32, #tpu.memory_space<vmem>>, %arg3: memref<1x16xf32, #tpu.memory_space<vmem>>, %arg4: memref<16x24xf32, #tpu.memory_space<vmem>>, %arg5: memref<1x24xf32, #tpu.memory_space<vmem>>, %arg6: memref<32x32xf32, #tpu.memory_space<vmem>>, %arg7: memref<1x32xf32, #tpu.memory_space<vmem>>, %arg8: memref<32x24xf32, #tpu.memory_space<vmem>>, %arg9: memref<24x24xf32, #tpu.memory_space<vmem>>, %arg10: memref<1x24xf32, #tpu.memory_space<vmem>>, %arg11: memref<32x40xf32, #tpu.memory_space<vmem>>) attributes {dimension_semantics = [#tpu.dimension_semantics<parallel>], iteration_bounds = array<i64: 2>, scalar_prefetch = 0 : i64, scratch_operands = 0 : i64, tpu.core_type = #tpu.core_type<tc>, window_params = [{transform_indices = @transform_0, window_bounds = array<i64: 32, 32>}, {pipeline_mode = #tpu.pipeline_mode<synchronous>, transform_indices = @transform_1, window_bounds = array<i64: 32, 16>}, {pipeline_mode = #tpu.pipeline_mode<synchronous>, transform_indices = @transform_2, window_bounds = array<i64: 1, 16>}, {pipeline_mode = #tpu.pipeline_mode<synchronous>, transform_indices = @transform_3, window_bounds = array<i64: 16, 24>}, {pipeline_mode = #tpu.pipeline_mode<synchronous>, transform_indices = @transform_4, window_bounds = array<i64: 1, 24>}, {pipeline_mode = #tpu.pipeline_mode<synchronous>, transform_indices = @transform_5, window_bounds = array<i64: 32, 32>}, {pipeline_mode = #tpu.pipeline_mode<synchronous>, transform_indices = @transform_6, window_bounds = array<i64: 1, 32>}, {pipeline_mode = #tpu.pipeline_mode<synchronous>, transform_indices = @transform_7, window_bounds = array<i64: 32, 24>}, {pipeline_mode = #tpu.pipeline_mode<synchronous>, transform_indices = @transform_8, window_bounds = array<i64: 24, 24>}, {pipeline_mode = #tpu.pipeline_mode<synchronous>, transform_indices = @transform_9, window_bounds = array<i64: 1, 24>}, {transform_indices = @transform_10, window_bounds = array<i64: 32, 40>}]} {
    %c0 = arith.constant 0 : index
    %c0_0 = arith.constant 0 : index
    %0 = vector.load %arg1[%c0, %c0_0] : memref<32x32xf32, #tpu.memory_space<vmem>>, vector<32x32xf32>
    %c0_1 = arith.constant 0 : index
    %c0_2 = arith.constant 0 : index
    %1 = vector.load %arg2[%c0_1, %c0_2] : memref<32x16xf32, #tpu.memory_space<vmem>>, vector<32x16xf32>
    %cst = arith.constant dense<0.000000e+00> : vector<32x16xf32>
    %2 = tpu.matmul %0, %1, %cst {dimension_numbers = #tpu.dot_dimension_numbers<[1], [0], [0], [1], [0, 0, 1, 1], [], []>} : vector<32x32xf32>, vector<32x16xf32>, vector<32x16xf32> -> vector<32x16xf32>
    %c0_3 = arith.constant 0 : index
    %c0_4 = arith.constant 0 : index
    %3 = vector.load %arg3[%c0_3, %c0_4] : memref<1x16xf32, #tpu.memory_space<vmem>>, vector<1x16xf32>
    %4 = vector.broadcast %3 : vector<1x16xf32> to vector<32x16xf32>
    %5 = arith.addf %2, %4 : vector<32x16xf32>
    %c0_5 = arith.constant 0 : index
    %c0_6 = arith.constant 0 : index
    %6 = vector.load %arg4[%c0_5, %c0_6] : memref<16x24xf32, #tpu.memory_space<vmem>>, vector<16x24xf32>
    %cst_7 = arith.constant dense<0.000000e+00> : vector<32x24xf32>
    %7 = tpu.matmul %5, %6, %cst_7 {dimension_numbers = #tpu.dot_dimension_numbers<[1], [0], [0], [1], [0, 0, 1, 1], [], []>} : vector<32x16xf32>, vector<16x24xf32>, vector<32x24xf32> -> vector<32x24xf32>
    %c0_8 = arith.constant 0 : index
    %c0_9 = arith.constant 0 : index
    %8 = vector.load %arg5[%c0_8, %c0_9] : memref<1x24xf32, #tpu.memory_space<vmem>>, vector<1x24xf32>
    %9 = vector.broadcast %8 : vector<1x24xf32> to vector<32x24xf32>
    %10 = arith.addf %7, %9 : vector<32x24xf32>
    %cst_10 = arith.constant 0.000000e+00 : f32
    %11 = vector.broadcast %cst_10 : f32 to vector<32x24xf32>
    %12 = arith.maximumf %10, %11 : vector<32x24xf32>
    %c0_11 = arith.constant 0 : index
    %c0_12 = arith.constant 0 : index
    %13 = vector.load %arg6[%c0_11, %c0_12] : memref<32x32xf32, #tpu.memory_space<vmem>>, vector<32x32xf32>
    %cst_13 = arith.constant dense<0.000000e+00> : vector<32x32xf32>
    %14 = tpu.matmul %0, %13, %cst_13 {dimension_numbers = #tpu.dot_dimension_numbers<[1], [0], [0], [1], [0, 0, 1, 1], [], []>} : vector<32x32xf32>, vector<32x32xf32>, vector<32x32xf32> -> vector<32x32xf32>
    %c0_14 = arith.constant 0 : index
    %c0_15 = arith.constant 0 : index
    %15 = vector.load %arg7[%c0_14, %c0_15] : memref<1x32xf32, #tpu.memory_space<vmem>>, vector<1x32xf32>
    %16 = vector.broadcast %15 : vector<1x32xf32> to vector<32x32xf32>
    %17 = arith.addf %14, %16 : vector<32x32xf32>
    %cst_16 = arith.constant 0.000000e+00 : f32
    %18 = vector.broadcast %cst_16 : f32 to vector<32x32xf32>
    %19 = arith.maximumf %17, %18 : vector<32x32xf32>
    %c0_17 = arith.constant 0 : index
    %c0_18 = arith.constant 0 : index
    %20 = vector.load %arg8[%c0_17, %c0_18] : memref<32x24xf32, #tpu.memory_space<vmem>>, vector<32x24xf32>
    %cst_19 = arith.constant dense<0.000000e+00> : vector<32x24xf32>
    %21 = tpu.matmul %19, %20, %cst_19 {dimension_numbers = #tpu.dot_dimension_numbers<[1], [0], [0], [1], [0, 0, 1, 1], [], []>} : vector<32x32xf32>, vector<32x24xf32>, vector<32x24xf32> -> vector<32x24xf32>
    %c0_20 = arith.constant 0 : index
    %c0_21 = arith.constant 0 : index
    %22 = vector.load %arg9[%c0_20, %c0_21] : memref<24x24xf32, #tpu.memory_space<vmem>>, vector<24x24xf32>
    %cst_22 = arith.constant dense<0.000000e+00> : vector<32x24xf32>
    %23 = tpu.matmul %12, %22, %cst_22 {dimension_numbers = #tpu.dot_dimension_numbers<[1], [0], [0], [1], [0, 0, 1, 1], [], []>} : vector<32x24xf32>, vector<24x24xf32>, vector<32x24xf32> -> vector<32x24xf32>
    %24 = arith.addf %21, %23 : vector<32x24xf32>
    %c0_23 = arith.constant 0 : index
    %c0_24 = arith.constant 0 : index
    %25 = vector.load %arg10[%c0_23, %c0_24] : memref<1x24xf32, #tpu.memory_space<vmem>>, vector<1x24xf32>
    %26 = vector.broadcast %25 : vector<1x24xf32> to vector<32x24xf32>
    %27 = arith.addf %24, %26 : vector<32x24xf32>
    %c0_25 = arith.constant 0 : index
    %c0_26 = arith.constant 0 : index
    %28 = vector.load %arg11[%c0_25, %c0_26] : memref<32x40xf32, #tpu.memory_space<vmem>>, vector<32x16xf32>
    tpu.vector_store %arg11[%c0_25, %c0_26], %5 {strides = array<i32>} : memref<32x40xf32, #tpu.memory_space<vmem>>, vector<32x16xf32>,
    %c0_27 = arith.constant 0 : index
    %c16 = arith.constant 16 : index
    %29 = vector.load %arg11[%c0_27, %c16] : memref<32x40xf32, #tpu.memory_space<vmem>>, vector<32x24xf32>
    tpu.vector_store %arg11[%c0_27, %c16], %27 {strides = array<i32>} : memref<32x40xf32, #tpu.memory_space<vmem>>, vector<32x24xf32>,
    return
  }
  func.func @transform_0(%arg0: i32) -> (i32, i32) {
    %c0_i32 = arith.constant 0 : i32
    %c0_i32_0 = arith.constant 0 : i32
    return %arg0, %c0_i32 : i32, i32
  }
  func.func @transform_1(%arg0: i32) -> (i32, i32) {
    %c0_i32 = arith.constant 0 : i32
    %c0_i32_0 = arith.constant 0 : i32
    %c0_i32_1 = arith.constant 0 : i32
    return %c0_i32, %c0_i32_0 : i32, i32
  }
  func.func @transform_2(%arg0: i32) -> (i32, i32) {
    %c0_i32 = arith.constant 0 : i32
    %c0_i32_0 = arith.constant 0 : i32
    %c0_i32_1 = arith.constant 0 : i32
    return %c0_i32, %c0_i32_0 : i32, i32
  }
  func.func @transform_3(%arg0: i32) -> (i32, i32) {
    %c0_i32 = arith.constant 0 : i32
    %c0_i32_0 = arith.constant 0 : i32
    %c0_i32_1 = arith.constant 0 : i32
    return %c0_i32, %c0_i32_0 : i32, i32
  }
  func.func @transform_4(%arg0: i32) -> (i32, i32) {
    %c0_i32 = arith.constant 0 : i32
    %c0_i32_0 = arith.constant 0 : i32
    %c0_i32_1 = arith.constant 0 : i32
    return %c0_i32, %c0_i32_0 : i32, i32
  }
  func.func @transform_5(%arg0: i32) -> (i32, i32) {
    %c0_i32 = arith.constant 0 : i32
    %c0_i32_0 = arith.constant 0 : i32
    %c0_i32_1 = arith.constant 0 : i32
    return %c0_i32, %c0_i32_0 : i32, i32
  }
  func.func @transform_6(%arg0: i32) -> (i32, i32) {
    %c0_i32 = arith.constant 0 : i32
    %c0_i32_0 = arith.constant 0 : i32
    %c0_i32_1 = arith.constant 0 : i32
    return %c0_i32, %c0_i32_0 : i32, i32
  }
  func.func @transform_7(%arg0: i32) -> (i32, i32) {
    %c0_i32 = arith.constant 0 : i32
    %c0_i32_0 = arith.constant 0 : i32
    %c0_i32_1 = arith.constant 0 : i32
    return %c0_i32, %c0_i32_0 : i32, i32
  }
  func.func @transform_8(%arg0: i32) -> (i32, i32) {
    %c0_i32 = arith.constant 0 : i32
    %c0_i32_0 = arith.constant 0 : i32
    %c0_i32_1 = arith.constant 0 : i32
    return %c0_i32, %c0_i32_0 : i32, i32
  }
  func.func @transform_9(%arg0: i32) -> (i32, i32) {
    %c0_i32 = arith.constant 0 : i32
    %c0_i32_0 = arith.constant 0 : i32
    %c0_i32_1 = arith.constant 0 : i32
    return %c0_i32, %c0_i32_0 : i32, i32
  }
  func.func @transform_10(%arg0: i32) -> (i32, i32) {
    %c0_i32 = arith.constant 0 : i32
    %c0_i32_0 = arith.constant 0 : i32
    return %arg0, %c0_i32 : i32, i32
  }
}

</mosaic_0001>

<bundles_post_ra>
// kernel: tpu_custom_call.1
= control target key start
LH: loop header
LB: loop body
LE: loop exit
PB: predicated region body
PF: predicated region fallthrough
CT: control target
= control target key end

     0   :  { %s1190_s13 = smov 0   ;;  %s1307_s0 = inlined_call_operand.vmem [shape: f32[64,32], index: 0, kind: input, shape index: {}]   ;;  %s1308_s1 = inlined_call_operand.vmem [shape: f32[32,16], index: 1, kind: input, shape index: {}]   ;;  %s1309_s2 = inlined_call_operand.vmem [shape: f32[1,16], index: 2, kind: input, shape index: {}]   ;;  %s1310_s3 = inlined_call_operand.vmem [shape: f32[16,24], index: 3, kind: input, shape index: {}]   ;;  %s1311_s4 = inlined_call_operand.vmem [shape: f32[1,24], index: 4, kind: input, shape index: {}]   ;;  %s1312_s5 = inlined_call_operand.vmem [shape: f32[32,32], index: 5, kind: input, shape index: {}]   ;;  %s1313_s6 = inlined_call_operand.vmem [shape: f32[1,32], index: 6, kind: input, shape index: {}]   ;;  %s1314_s7 = inlined_call_operand.vmem [shape: f32[32,24], index: 7, kind: input, shape index: {}]   ;;  %s1315_s8 = inlined_call_operand.vmem [shape: f32[24,24], index: 8, kind: input, shape index: {}]   ;;  %s1316_s9 = inlined_call_operand.vmem [shape: f32[1,24], index: 9, kind: input, shape index: {}]   ;;  %s1317_s10 = inlined_call_operand.vmem [shape: f32[64,40], index: 10, kind: output, shape index: {}]  }
   0x1 LB: > { %s981_s14 = sadd.s32 4294967295, %s1132_s13   ;;  %p985_p0 = scmp.ge.s32.totalorder %s1132_s13, 1  ;;  %s1132_s13 = sphi %s1190_s13, %s20_s13  }
   0x2   : > { %p313_p1 = scmp.lt.s32.totalorder %s1132_s13, 3 }
   0x4   : > { %p314_p2 = pnand %p985_p0, %p313_p1 }
   0x5   : > { %s986_s19 = sshll.u32 (!%p314_p2), %s981_s14, 2  ;;  %s1134_s28 = smov (!%p314_p2), 16  }
   0x6   : > { %317 = sbr.rel (%p314_p2) target bundleno = 749 (0x2ed), region = 60  ;;  %p352_p3 = scmp.lt.s32.totalorder (!%p314_p2), %s986_s19, 7 }
   0xb   : > { %v370_v0 = vld [vmem:[%s1308_s1 + $0x18] sm:$0xff]  ;;  %v369_v1 = vld [vmem:[%s1308_s1 + $0x10] sm:$0xff]  ;;  %v368_v2 = vld [vmem:[%s1308_s1 + $0x8] sm:$0xff]  ;;  %s1319_s19 = smov (!%p352_p3, %s986_s19), 7  ;;  %vm378_vm0 = vcmask 261120   ;;  %vm485_vm1 = vcmask 130048  }
   0xc   : > { %1053 = vmatprep.subr.mxu0 %v370_v0  ;;  %v367_v3 = vld [vmem:[%s1308_s1] sm:$0xff]  ;;  %s987_s24 = sshll.u32 %s1319_s19, 3  ;;  %v477_v8 = vld [vmem:[%s1310_s3 + $0x8] sm:$0xff]  ;;  %v590_v10 = vld [vmem:[%s1312_s5 + $0x18] sm:$0xff]  ;;  %vm694_vm2 = vcmask 195584   ;;  %vm920_vm3 = vcmask 326784  }
   0xd   : > { %1054 = vmatpush3.msra.mxu0 %v370_v0  ;;  %s355_s27 = scalar_lea.vmem %s1307_s0, %s987_s24  ;;  %1067 = vmatprep.subr.mxu1 %v477_v8  ;;  %v476_v9 = vld [vmem:[%s1310_s3] sm:$0xff]  ;;  %s1235_s19 = scalar_lea.vmem %s1317_s10, %s987_s24  ;;  %v589_v17 = vld [vmem:[%s1312_s5 + $0x10] sm:$0xff]  ;;  %v588_v20 = vld [vmem:[%s1312_s5 + $0x8] sm:$0xff] }
   0xe   : > { %1055 = vmatprep.subr.mxu0 %v369_v1  ;;  %v363_v4 = vld [vmem:[%s355_s27] sm:$0xff]  ;;  %v364_v5 = vld [vmem:[%s355_s27 + $0x8] sm:$0xff]  ;;  %v365_v6 = vld [vmem:[%s355_s27 + $0x10] sm:$0xff]  ;;  %1068 = vmatpush3.msra.mxu1 %v477_v8 }
   0xf   : > { %1056 = vmatpush3.msra.mxu0 %v369_v1  ;;  %1061 = vmatprep.mubr.msk.f32.mxu0 %vm378_vm0, %v363_v4  ;;  %v366_v7 = vld [vmem:[%s355_s27 + $0x18] sm:$0xff]  ;;  %v990_v12 = vld [vmem:[%s1309_s2] ss:$0 sm:$0xff]  ;;  %v693_v23 = vld [vmem:[%s1315_s8 + $0x10] sm:$0xff] }
  0x10   : > { %1057 = vmatprep.subr.mxu0 %v368_v2  ;;  %1069 = vmatprep.subr.mxu1 %v476_v9  ;;  %v587_v22 = vld [vmem:[%s1312_s5] sm:$0xff]  ;;  %v692_v24 = vld [vmem:[%s1315_s8 + $0x8] sm:$0xff]  ;;  %v690_v26 = vld [vmem:[%s1314_s7 + $0x18] sm:$0xff] }
  0x11   : > { %1058 = vmatpush3.msra.mxu0 %v368_v2  ;;  %1070 = vmatpush3.msra.mxu1 %v476_v9  ;;  %v691_v25 = vld [vmem:[%s1315_s8] sm:$0xff]  ;;  %v689_v27 = vld [vmem:[%s1314_s7 + $0x10] sm:$0xff]  ;;  %v688_v28 = vld [vmem:[%s1314_s7 + $0x8] sm:$0xff] }
  0x12   : > { %1059 = vmatprep.subr.mxu0 %v367_v3  ;;  %1077 = vmatprep.subr.mxu1 %v590_v10  ;;  %v687_v29 = vld [vmem:[%s1314_s7] sm:$0xff] }
  0x13   : > { %1060 = vmatpush3.msra.mxu0 %v367_v3  ;;  %v995_v30 = vld [vmem:[%s1311_s4] ss:$0 sm:$0xff] }
  0x14   : > { %1062 = vmatmul.mubr.msk.f32.vlgmr.msra.gmra.mxu0 %vm378_vm0, %v364_v5  ;;  %1091 = vmatprep.subr.mxu0 %v693_v23  ;;  %v1000_v41 = vld [vmem:[%s1313_s6] ss:$0 sm:$0xff] }
  0x15   : > { %1064 = vmatprep.mubr.msk.f32.mxu0 %vm378_vm0, %v365_v6  ;;  %1092 = vmatpush3.msra.mxu0 %v693_v23  ;;  %v1013_v62 = vld [vmem:[%s1316_s9] ss:$0 sm:$0xff] }
  0x16   : > { %1093 = vmatprep.subr.mxu0 %v692_v24 }
  0x17   : > { %1094 = vmatpush3.msra.mxu0 %v692_v24 }
  0x18   : > { %1065 = vmatmul.mubr.msk.f32.gmra.mxu0 %vm378_vm0, %v366_v7  ;;  %1095 = vmatprep.subr.mxu0 %v691_v25 }
  0x19   : > { %1096 = vmatpush3.msra.mxu0 %v691_v25 }
  0xd4   : > { %v1063_v11 = vpop.f32.mrf.mxu0 }
  0xd5   : > { %v463_v15 = vadd.f32 %v1063_v11, %v990_v12 }
  0xd6   : > { %v457_v13 = vpop.f32.mrf.mxu0 }
  0xd7   : > { %v458_v14 = vadd.f32 %v990_v12, %v457_v13  ;;  %901 = vst.msk [vmem:[%s1235_s19 + $0x8] sm:$0xff] %vm485_vm1, %v463_v15 }
  0xd8   : > { %v1066_v16 = vpop.f32.mrf.mxu0 }
  0xd9   : > { %900 = vst.msk [vmem:[%s1235_s19] sm:$0xff] %vm485_vm1, %v458_v14  ;;  %1071 = vmatprep.mubr.msk.f32.mxu1 %vm485_vm1, %v458_v14  ;;  %v473_v21 = vadd.f32 %v1066_v16, %v990_v12 }
  0xda   : > { %v467_v18 = vpop.f32.mrf.mxu0  ;;  %1072 = vmatmul.mubr.msk.f32.vlgmr.msra.gmra.mxu1 %vm485_vm1, %v463_v15 }
  0xdb   : > { %v468_v19 = vadd.f32 %v990_v12, %v467_v18  ;;  %1078 = vmatpush3.msra.mxu1 %v590_v10  ;;  %903 = vst.msk [vmem:[%s1235_s19 + $0x18] sm:$0xff] %vm485_vm1, %v473_v21 }
  0xdc   : > { %1079 = vmatprep.subr.mxu1 %v589_v17 }
  0xdd   : > { %902 = vst.msk [vmem:[%s1235_s19 + $0x10] sm:$0xff] %vm485_vm1, %v468_v19  ;;  %1080 = vmatpush3.msra.mxu1 %v589_v17  ;;  %1074 = vmatprep.mubr.msk.f32.mxu1 %vm485_vm1, %v468_v19 }
  0xde   : > { %1081 = vmatprep.subr.mxu1 %v588_v20  ;;  %1075 = vmatmul.mubr.msk.f32.gmra.mxu1 %vm485_vm1, %v473_v21 }
  0xdf   : > { %1082 = vmatpush3.msra.mxu1 %v588_v20  ;;  %1085 = vmatprep.mubr.msk.f32.mxu1 %vm378_vm0, %v363_v4 }
  0xe0   : > { %1083 = vmatprep.subr.mxu1 %v587_v22 }
  0xe1   : > { %1084 = vmatpush3.msra.mxu1 %v587_v22 }
  0xe2   : > { %1086 = vmatmul.mubr.msk.f32.vlgmr.msra.gmra.mxu1 %vm378_vm0, %v364_v5  ;;  %1103 = vmatprep.subr.mxu1 %v690_v26 }
  0xe3   : > { %1088 = vmatprep.mubr.msk.f32.mxu1 %vm378_vm0, %v365_v6  ;;  %1104 = vmatpush3.msra.mxu1 %v690_v26 }
  0xe4   : > { %1105 = vmatprep.subr.mxu1 %v689_v27 }
  0xe5   : > { %1106 = vmatpush3.msra.mxu1 %v689_v27 }
  0xe6   : > { %1089 = vmatmul.mubr.msk.f32.gmra.mxu1 %vm378_vm0, %v366_v7  ;;  %1107 = vmatprep.subr.mxu1 %v688_v28 }
  0xe7   : > { %1108 = vmatpush3.msra.mxu1 %v688_v28 }
  0xe8   : > { %1109 = vmatprep.subr.mxu1 %v687_v29 }
  0xe9   : > { %1110 = vmatpush3.msra.mxu1 %v687_v29 }
 0x19a   : > { %v1073_v31 = vpop.f32.mrf.mxu1 }
 0x19b   : > { %v570_v32 = vadd.f32 %v1073_v31, %v995_v30 }
 0x19c   : > { %v564_v33 = vpop.f32.mrf.mxu1 }
 0x19d   : > { %v565_v34 = vadd.f32 %v995_v30, %v564_v33  ;;  %v584_v37 = vmax.f32 %v570_v32, 0.0 }
 0x19e   : > { %v1076_v35 = vpop.f32.mrf.mxu1 }
 0x19f   : > { %v583_v36 = vmax.f32 %v565_v34, 0.0  ;;  %v580_v38 = vadd.f32 %v1076_v35, %v995_v30 }
 0x1a0   : > { %v574_v39 = vpop.f32.mrf.mxu1 }
 0x1a1   : > { %v575_v40 = vadd.f32 %v995_v30, %v574_v39  ;;  %1097 = vmatprep.mubr.msk.f32.mxu0 %vm694_vm2, %v583_v36  ;;  %v586_v44 = vmax.f32 %v580_v38, 0.0 }
 0x1a2   : > { %v1087_v42 = vpop.f32.mrf.mxu1  ;;  %1098 = vmatmul.mubr.msk.f32.vlgmr.msra.gmra.mxu0 %vm694_vm2, %v584_v37 }
 0x1a3   : > { %v585_v43 = vmax.f32 %v575_v40, 0.0  ;;  %v670_v45 = vadd.f32 %v1087_v42, %v1000_v41 }
 0x1a4   : > { %v664_v46 = vpop.f32.mrf.mxu1 }
 0x1a5   : > { %v665_v47 = vadd.f32 %v1000_v41, %v664_v46  ;;  %1100 = vmatprep.mubr.msk.f32.mxu0 %vm694_vm2, %v585_v43  ;;  %v684_v50 = vmax.f32 %v670_v45, 0.0 }
 0x1a6   : > { %v1090_v48 = vpop.f32.mrf.mxu1  ;;  %1101 = vmatmul.mubr.msk.f32.gmra.mxu0 %vm694_vm2, %v586_v44 }
 0x1a7   : > { %v683_v49 = vmax.f32 %v665_v47, 0.0  ;;  %v680_v51 = vadd.f32 %v1090_v48, %v1000_v41 }
 0x1a8   : > { %v674_v52 = vpop.f32.mrf.mxu1 }
 0x1a9   : > { %v675_v53 = vadd.f32 %v1000_v41, %v674_v52  ;;  %1111 = vmatprep.mubr.msk.f32.mxu1 %vm378_vm0, %v683_v49  ;;  %v686_v55 = vmax.f32 %v680_v51, 0.0 }
 0x1aa   : > { %1112 = vmatmul.mubr.msk.f32.vlgmr.msra.gmra.mxu1 %vm378_vm0, %v684_v50 }
 0x1ab   : > { %v685_v54 = vmax.f32 %v675_v53, 0.0 }
 0x1ad   : > { %1114 = vmatprep.mubr.msk.f32.mxu1 %vm378_vm0, %v685_v54 }
 0x1ae   : > { %1115 = vmatmul.mubr.msk.f32.gmra.mxu1 %vm378_vm0, %v686_v55 }
 0x262   : > { %v1099_v56 = vpop.f32.mrf.mxu0 }
 0x264   : > { %v773_v57 = vpop.f32.mrf.mxu0 }
 0x266   : > { %v1102_v59 = vpop.f32.mrf.mxu0 }
 0x268   : > { %v783_v2 = vpop.f32.mrf.mxu0 }
 0x26a   : > { %v1113_v58 = vpop.f32.mrf.mxu1 }
 0x26b   : > { %v876_v0 = vadd.f32 %v1113_v58, %v1099_v56 }
 0x26c   : > { %v870_v60 = vpop.f32.mrf.mxu1 }
 0x26d   : > { %v871_v61 = vadd.f32 %v870_v60, %v773_v57  ;;  %v897_v5 = vadd.f32 %v1013_v62, %v876_v0 }
 0x26e   : > { %v1116_v63 = vpop.f32.mrf.mxu1 }
 0x26f   : > { %v896_v1 = vadd.f32 %v1013_v62, %v871_v61  ;;  %v886_v6 = vadd.f32 %v1116_v63, %v1102_v59 }
 0x270   : > { %v880_v3 = vpop.f32.mrf.mxu1 }
 0x271   : > { %v881_v4 = vadd.f32 %v880_v3, %v783_v2  ;;  %908 = vrot.lane.b32.xlu0 %v896_v1, %s1134_s28  ;;  %v899_v8 = vadd.f32 %v1013_v62, %v886_v6 }
 0x273   : > { %v898_v7 = vadd.f32 %v1013_v62, %v881_v4 }
 0x275   : > { %910 = vrot.lane.b32.xlu0 %v897_v5, %s1134_s28  ;;  %912 = vrot.lane.b32.xlu1 %v898_v7, %s1134_s28 }
 0x279   : > { %914 = vrot.lane.b32.xlu1 %v899_v8, %s1134_s28 }
 0x2e3   : > { %v909_v9 = vpop.permute.xlu0 %908 }
 0x2e4   : > { %921 = vst.msk [vmem:[%s1235_s19] sm:$0xff] %vm920_vm3, %v909_v9 }
 0x2e7   : > { %v911_v10 = vpop.permute.xlu0 %910  ;;  %v913_v11 = vpop.permute.xlu1 %912 }
 0x2e8   : > { %922 = vst.msk [vmem:[%s1235_s19 + $0x8] sm:$0xff] %vm920_vm3, %v911_v10  ;;  %923 = vst.msk [vmem:[%s1235_s19 + $0x10] sm:$0xff] %vm920_vm3, %v913_v11 }
 0x2eb   : > { %v915_v12 = vpop.permute.xlu1 %914 }
 0x2ec   : > { %924 = vst.msk [vmem:[%s1235_s19 + $0x18] sm:$0xff] %vm920_vm3, %v915_v12 }
 0x2ed PF: > { %s20_s13 = sadd.s32 1, %s1132_s13  }
 0x2ee   : > { %p17_p4 = scmp.ge.s32.totalorder %s20_s13, 4  }
 0x2f0   :  { %19 = sbr.rel (!%p17_p4) target bundleno = 1 (0x1), region = 90 }

</bundles_post_ra>
